<compile_context>
chip_gen: v5e
topology: v5e:2x2
jax: 0.10.0
libtpu: 0.0.40
codegen_flags: <defaults>
</compile_context>

<pallas_src>
import functools

import jax
import jax.numpy as jnp
from jax.experimental import pallas as pl
from jax.experimental.pallas import tpu as pltpu

SMOOTHING = 0.1
CONFIDENCE = 1.0 - SMOOTHING
NUM_CLS = 5  # module hard-codes "/ 5"

_LANES = 128


def _round_up(x, m):
    return ((x + m - 1) // m) * m


def _tree_sum(chunks):
    """Pairwise combine: breaks the serial VPU add chain (log-depth)."""
    while len(chunks) > 1:
        nxt = [a + b for a, b in zip(chunks[0::2], chunks[1::2])]
        if len(chunks) % 2:
            nxt.append(chunks[-1])
        chunks = nxt
    return chunks[0]


def label_smoothing_kernel(pred_ref, tgt_ref, out_ref, *, n_valid, tile_n):
    i = pl.program_id(0)

    # (C, TN) logits; samples on lanes (dense), classes on sublanes.
    # '+ smoothing/NUM_CLS' cancels exactly in lse - picked, so it is omitted.
    x = pred_ref[...].astype(jnp.float32) * CONFIDENCE            # (C, TN)

    # Stable log-sum-exp over the class (sublane) axis.
    m = jnp.max(x, axis=0, keepdims=True)                         # (1, TN)
    e = jnp.exp(x - m)                                            # (C, TN) EUP
    lse = m + jnp.log(jnp.sum(e, axis=0, keepdims=True))          # (1, TN)

    # x[i, target_i] via sublane-iota compare + select (pure VPU, no MXU).
    tgt = tgt_ref[...]                                            # (1, TN) i32
    cls_ids = jax.lax.broadcasted_iota(jnp.int32, x.shape, 0)     # (C, TN)
    picked = jnp.sum(jnp.where(cls_ids == tgt, x, 0.0),
                     axis=0, keepdims=True)                       # (1, TN)

    loss = lse - picked                                           # (1, TN)

    def reduce_and_store(vals):
        # Reduce TN lanes -> 128 lanes with lane-aligned whole-vreg adds
        # (no cross-lane XLU); final sum over tiles happens in the wrapper.
        chunks = [vals[:, k * _LANES:(k + 1) * _LANES]
                  for k in range(tile_n // _LANES)]
        out_ref[...] = _tree_sum(chunks)

    if n_valid % tile_n != 0:
        # Only the tail tile can contain out-of-bounds lanes; interior tiles
        # skip the mask work entirely.  The mask is a select applied after all
        # arithmetic, so garbage (NaN/Inf) in OOB lanes never propagates.
        last = pl.num_programs(0) - 1

        @pl.when(i == last)
        def _():
            gidx = i * tile_n + jax.lax.broadcasted_iota(
                jnp.int32, (1, tile_n), 1)
            reduce_and_store(jnp.where(gidx < n_valid, loss, 0.0))

        @pl.when(i != last)
        def _():
            reduce_and_store(loss)
    else:
        reduce_and_store(loss)


def label_smoothing_loss(pred, target, *, tile_n=32768):
    """pred: (N, C=5) float, target: (N,) int -> scalar float32 mean loss."""
    n, c = pred.shape
    assert c == NUM_CLS, f"module hard-codes {NUM_CLS} classes, got {c}"

    # Keep at least 2 tiles whenever possible so the "parallel" grid axis can
    # be split across both v7x TensorCores (harmless on v5e/v6e).
    tn = max(_LANES, min(tile_n, _round_up(pl.cdiv(n, 2), _LANES)))
    g = pl.cdiv(n, tn)

    # Lane-dense layout: classes -> sublanes, samples -> lanes.
    # Single XLA transpose copy; no pad pass (ragged tail handled in-kernel).
    # If pred arrives as bf16 it is NOT upcast here (kernel casts in-VMEM).
    pred_t = jnp.transpose(pred)                        # (C, N)
    tgt_t = target.astype(jnp.int32).reshape(1, n)      # free reshape

    kernel = functools.partial(label_smoothing_kernel, n_valid=n, tile_n=tn)

    partial = pl.pallas_call(
        kernel,
        out_shape=jax.ShapeDtypeStruct((1, g * _LANES), jnp.float32),
        grid_spec=pltpu.PrefetchScalarGridSpec(
            num_scalar_prefetch=0,
            grid=(g,),
            in_specs=[
                pl.BlockSpec((NUM_CLS, tn), lambda i: (0, i)),
                pl.BlockSpec((1, tn), lambda i: (0, i)),
            ],
            out_specs=pl.BlockSpec((1, _LANES), lambda i: (0, i)),
        ),
        compiler_params=pltpu.CompilerParams(
            dimension_semantics=("parallel",),
            vmem_limit_bytes=32 * 1024 * 1024,
        ),
    )(pred_t, tgt_t)

    # Per-tile, per-lane partial sums -> mean over the true N.
    return jnp.sum(partial) / jnp.float32(n)


if __name__ == "__main__":
    key = jax.random.PRNGKey(0)
    kp, kt = jax.random.split(key)

    # N not a multiple of 128 exercises the ragged-tail mask path.
    N, C = 300, NUM_CLS
    pred = jax.random.normal(kp, (N, C), dtype=jnp.float32)
    target = jax.random.randint(kt, (N,), 0, C, dtype=jnp.int32)

    # Pure-JAX reference of the module's forward math (constant included).
    x = CONFIDENCE * pred + SMOOTHING / NUM_CLS
    ref = jnp.mean(
        jax.scipy.special.logsumexp(x, axis=-1) - x[jnp.arange(N), target]
    )

    # Default (large-tile) config and a forced multi-tile / ragged-tail config.
    for tile_n in (32768, 128):
        loss = label_smoothing_loss(pred, target, tile_n=tile_n)
        jax.block_until_ready(loss)
        assert jnp.allclose(loss, ref, atol=1e-5, rtol=1e-5), (tile_n, loss, ref)

    print("KERNEL_OK")
</pallas_src>

<mosaic_0001>
module attributes {stable_mosaic.version = 11 : i64} {
  func.func @label_smoothing_kernel(%arg0: i32, %arg1: memref<5x256xf32, #tpu.memory_space<vmem>>, %arg2: memref<1x256xi32, #tpu.memory_space<vmem>>, %arg3: memref<1x128xf32, #tpu.memory_space<vmem>>) attributes {dimension_semantics = [#tpu.dimension_semantics<parallel>], iteration_bounds = array<i64: 2>, scalar_prefetch = 0 : i64, scratch_operands = 0 : i64, tpu.core_type = #tpu.core_type<tc>, window_params = [{transform_indices = @transform_0, window_bounds = array<i64: 5, 256>}, {transform_indices = @transform_1, window_bounds = array<i64: 1, 256>}, {transform_indices = @transform_2, window_bounds = array<i64: 1, 128>}]} {
    %c0 = arith.constant 0 : index
    %c0_0 = arith.constant 0 : index
    %0 = vector.load %arg1[%c0, %c0_0] : memref<5x256xf32, #tpu.memory_space<vmem>>, vector<5x256xf32>
    %cst = arith.constant 0.899999976 : f32
    %1 = vector.broadcast %cst : f32 to vector<5x256xf32>
    %2 = arith.mulf %0, %1 : vector<5x256xf32>
    %cst_1 = arith.constant dense<0xFF800000> : vector<256xf32>
    %3 = vector.multi_reduction <maximumf>, %2, %cst_1 [0] : vector<5x256xf32> to vector<256xf32>
    %4 = vector.shape_cast %3 : vector<256xf32> to vector<1x256xf32>
    %5 = vector.broadcast %4 : vector<1x256xf32> to vector<5x256xf32>
    %6 = arith.subf %2, %5 : vector<5x256xf32>
    %7 = math.exp %6 : vector<5x256xf32>
    %cst_2 = arith.constant dense<0.000000e+00> : vector<256xf32>
    %8 = vector.multi_reduction <add>, %7, %cst_2 [0] : vector<5x256xf32> to vector<256xf32>
    %9 = vector.shape_cast %8 : vector<256xf32> to vector<1x256xf32>
    %10 = math.log %9 : vector<1x256xf32>
    %11 = arith.addf %4, %10 : vector<1x256xf32>
    %c0_3 = arith.constant 0 : index
    %c0_4 = arith.constant 0 : index
    %12 = vector.load %arg2[%c0_3, %c0_4] : memref<1x256xi32, #tpu.memory_space<vmem>>, vector<1x256xi32>
    %13 = tpu.iota {dimensions = array<i32: 0>} : vector<5x256xi32>
    %14 = vector.broadcast %12 : vector<1x256xi32> to vector<5x256xi32>
    %15 = arith.cmpi eq, %13, %14 : vector<5x256xi32>
    %cst_5 = arith.constant 0.000000e+00 : f32
    %16 = vector.broadcast %cst_5 : f32 to vector<5x256xf32>
    %17 = arith.select %15, %2, %16 : vector<5x256xi1>, vector<5x256xf32>
    %cst_6 = arith.constant dense<0.000000e+00> : vector<256xf32>
    %18 = vector.multi_reduction <add>, %17, %cst_6 [0] : vector<5x256xf32> to vector<256xf32>
    %19 = vector.shape_cast %18 : vector<256xf32> to vector<1x256xf32>
    %20 = arith.subf %11, %19 : vector<1x256xf32>
    %c1_i32 = arith.constant 1 : i32
    %21 = arith.cmpi eq, %arg0, %c1_i32 : i32
    %22 = arith.extui %21 : i1 to i32
    %c0_i32 = arith.constant 0 : i32
    %23 = arith.cmpi ne, %22, %c0_i32 : i32
    scf.if %23 {
      %c256_i32 = arith.constant 256 : i32
      %27 = arith.muli %arg0, %c256_i32 : i32
      %28 = tpu.iota {dimensions = array<i32: 1>} : vector<1x256xi32>
      %29 = vector.broadcast %27 : i32 to vector<1x256xi32>
      %30 = arith.addi %29, %28 : vector<1x256xi32>
      %c300_i32 = arith.constant 300 : i32
      %31 = vector.broadcast %c300_i32 : i32 to vector<1x256xi32>
      %32 = arith.cmpi slt, %30, %31 : vector<1x256xi32>
      %cst_9 = arith.constant 0.000000e+00 : f32
      %33 = vector.broadcast %cst_9 : f32 to vector<1x256xf32>
      %34 = arith.select %32, %20, %33 : vector<1x256xi1>, vector<1x256xf32>
      %35 = vector.extract_strided_slice %34 {offsets = [0, 0], sizes = [1, 128], strides = [1, 1]} : vector<1x256xf32> to vector<1x128xf32>
      %36 = vector.extract_strided_slice %34 {offsets = [0, 128], sizes = [1, 128], strides = [1, 1]} : vector<1x256xf32> to vector<1x128xf32>
      %37 = arith.addf %35, %36 : vector<1x128xf32>
      %c0_10 = arith.constant 0 : index
      %c0_11 = arith.constant 0 : index
      %38 = vector.load %arg3[%c0_10, %c0_11] : memref<1x128xf32, #tpu.memory_space<vmem>>, vector<1x128xf32>
      tpu.vector_store %arg3[%c0_10, %c0_11], %37 {strides = array<i32>} : memref<1x128xf32, #tpu.memory_space<vmem>>, vector<1x128xf32>,
    } else {
    }
    %c1_i32_7 = arith.constant 1 : i32
    %24 = arith.cmpi ne, %arg0, %c1_i32_7 : i32
    %25 = arith.extui %24 : i1 to i32
    %c0_i32_8 = arith.constant 0 : i32
    %26 = arith.cmpi ne, %25, %c0_i32_8 : i32
    scf.if %26 {
      %27 = vector.extract_strided_slice %20 {offsets = [0, 0], sizes = [1, 128], strides = [1, 1]} : vector<1x256xf32> to vector<1x128xf32>
      %28 = vector.extract_strided_slice %20 {offsets = [0, 128], sizes = [1, 128], strides = [1, 1]} : vector<1x256xf32> to vector<1x128xf32>
      %29 = arith.addf %27, %28 : vector<1x128xf32>
      %c0_9 = arith.constant 0 : index
      %c0_10 = arith.constant 0 : index
      %30 = vector.load %arg3[%c0_9, %c0_10] : memref<1x128xf32, #tpu.memory_space<vmem>>, vector<1x128xf32>
      tpu.vector_store %arg3[%c0_9, %c0_10], %29 {strides = array<i32>} : memref<1x128xf32, #tpu.memory_space<vmem>>, vector<1x128xf32>,
    } else {
    }
    return
  }
  func.func @transform_0(%arg0: i32) -> (i32, i32) {
    %c0_i32 = arith.constant 0 : i32
    %c0_i32_0 = arith.constant 0 : i32
    return %c0_i32, %arg0 : i32, i32
  }
  func.func @transform_1(%arg0: i32) -> (i32, i32) {
    %c0_i32 = arith.constant 0 : i32
    %c0_i32_0 = arith.constant 0 : i32
    return %c0_i32, %arg0 : i32, i32
  }
  func.func @transform_2(%arg0: i32) -> (i32, i32) {
    %c0_i32 = arith.constant 0 : i32
    %c0_i32_0 = arith.constant 0 : i32
    return %c0_i32, %arg0 : i32, i32
  }
}

</mosaic_0001>

<bundles_post_ra>
// kernel: tpu_custom_call.1
= control target key start
LH: loop header
LB: loop body
LE: loop exit
PB: predicated region body
PF: predicated region fallthrough
CT: control target
= control target key end

     0   :  { %7 = vsyncpa [#allocation3], 0  ;;  %s854_s0 = inlined_call_operand.hbm [shape: f32[5,300], index: 0, kind: input, shape index: {}]   ;;  %s855_s1 = inlined_call_operand.hbm [shape: s32[1,300], index: 1, kind: input, shape index: {}]   ;;  %s856_s2 = inlined_call_operand.hbm [shape: f32[1,256], index: 2, kind: output, shape index: {}]  }
   0x1   :  { %9 = vsyncpa [#allocation3 + $0x1], 0 }
   0x2   :  { %10 = vsyncpa [#allocation6], 0 }
   0x3   :  { %12 = vsyncpa [#allocation6 + $0x1], 0 }
   0x4   :  { %13 = vsyncpa [#allocation4], 0 }
   0x5   :  { %15 = vsyncpa [#allocation4 + $0x1], 0  ;;  %s654_s9 = smov 0   ;;  %s656_s10 = smov 0  }
   0x6   :  { %s658_s11 = smov 0   ;;  %s660_s12 = smov 0  }
   0x7 LB: > { %s675_s13 = sadd.s32 4294967295, %s635_s12   ;;  %s416_s14 = sadd.s32 4294967294, %s635_s12   ;;  %s635_s12 = sphi %s660_s12, %s872_s12   ;;  %s631_s11 = sphi %s658_s11, %s871_s11   ;;  %s627_s10 = sphi %s656_s10, %s870_s10   ;;  %s623_s9 = sphi %s654_s9, %s869_s9  }
   0x8   : > { %s679_s15 = sadd.s32 1, %s635_s12   ;;  %s28_s16 = sadd.s32 1, %s631_s11 }
   0x9   : > { %s25_s17 = ssub.s32 %s635_s12, %s679_s15  ;;  %p35_p0 = scmp.ne.s32.totalorder %s631_s11, %s627_s10 }
   0xa   : > { %p26_p1 = scmp.eq.s32.totalorder %s25_s17, 0  ;;  %p36_p2 = scmp.eq.s32.totalorder %s635_s12, 0 }
   0xb   : > { %p41_p3 = scmp.ne.s32.totalorder %s627_s10, %s623_s9  ;;  %p42_p4 = scmp.eq.s32.totalorder %s675_s13, 0 }
   0xc   : > { %s691_s18 = scalar_select %p26_p1, %s631_s11, %s28_s16  }
   0xd   : > { %p693_p5 = por %p36_p2, %p35_p0  ;;  %p697_p6 = por %p42_p4, %p41_p3 }
   0xe   : > { %p859_p7 = scmp.eq.s32.totalorder %s675_s13, 1  ;;  %p97_p8 = scmp.eq.s32.totalorder %s416_s14, 1 }
   0xf   : > { %p857_p11 = scmp.ge.s32.totalorder %s635_s12, 2 }
  0x10   : > { %p704_p9 = por %p859_p7, %p35_p0  ;;  %p708_p10 = por %p97_p8, %p41_p3 }
  0x11   : > { %113 = sbr.rel (%p857_p11) target bundleno = 92 (0x5c), region = 16 }
  0x12   : > { %s863_s22 = scalar_select %p708_p10, 1, 0 }
  0x16   : > { %116 = sbr.rel (!%p693_p5) target bundleno = 58 (0x3a), region = 20  ;;  %s117_s23 = sand.u32 (%p693_p5), 1, %s631_s11  }
  0x17   : > { %s420_s24 = sshll.u32 (%p693_p5), %s635_s12, 1  ;;  %s419_s25 = sshll.u32 (%p693_p5), %s117_s23, 4 }
  0x18   : > { %s123_s26 = ssub.s32 (%p693_p5), 3, %s420_s24  ;;  %s722_s30 = scalar_lea.sflag (%p693_p5), [#allocation3], %s117_s23 }
  0x19   : > { %p124_p12 = scmp.lt.s32.totalorder (%p693_p5), %s123_s26, 2  ;;  %s121_s3 = scalar_lea.vmem (%p693_p5), [#allocation2], %s419_s25 }
  0x1b   : > { %s874_s26 = smov (!%p124_p12, %s123_s26), 2 }
  0x1c   : > { %s421_s27 = sshll.u32 %s874_s26, 3 }
  0x1d   : > { %s127_s28 = ssub.s32 16, %s421_s27 }
  0x1e   : > { %s128_s29 = sshll.u32 %s127_s28, 4 }
  0x1f   : > { %129 = vsyncadd %s722_s30, %s128_s29  ;;  %p725_p13 = scmp.ne.s32.totalorder %s421_s27, 0  ;;  %s437_s5 = sshll.u32 %s635_s12, 4 }
  0x20   : > { %s132_s8 = scalar_lea.hbm %s854_s0, %s437_s5  ;;  %s858_s14 = sshll.u32 %s874_s26, 7 }
  0x21   : > { %s135_s16 = sshll.u32 %s132_s8, 4  ;;  %s734_s17 = sshll.u32 %s121_s3, 4  ;;  %s136_s16 = int_to_ptr.hbm [resolvable:$true] %s135_s16  ;;  %s138_s17 = int_to_ptr.vmem [resolvable:$true] %s734_s17 }
  0x22   : > { %s487_s23 = sshra.s32 %s136_s16, 4  ;;  %s489_s24 = sshrl.u32 %s858_s14, 4  ;;  %s488_s23 = int_to_ptr.hbm [resolvable:$true] %s487_s23 }
  0x23   : > { %s494_s25 = scalar_lea.hbm %s488_s23, %s489_s24  ;;  %s498_s29 = scalar_lea.hbm %s854_s0, 24 }
  0x24   : > { %p495_p0 = scmp.ne.s32.totalorder %s488_s23, %s494_s25  ;;  %p499_p3 = scmp.lt.s32.totalorder %s488_s23, %s854_s0 }
  0x25   : > { %p500_p4 = scmp.lt.s32.totalorder %s498_s29, %s494_s25 }
  0x26   : > { %p496_p1 = pnand %p495_p0, %p725_p13 }
  0x27   : > { %p501_p8 = por %p500_p4, %p499_p3 }
  0x28   : > { %p497_p2 = pneg %p496_p1 }
  0x2a   : > { %p502_p12 = pnand %p501_p8, %p497_p2 }
  0x2c   : > { %505 = shalt.err (!%p502_p12)
}
  0x2d   : > { %s506_s3 = sshra.s32 %s138_s17, 4  ;;  %s637_s8 = smov [#allocation2]   ;;  %s507_s3 = int_to_ptr.vmem [resolvable:$true] %s506_s3 }
  0x2e   : > { %s513_s7 = scalar_lea.vmem %s507_s3, %s489_s24  ;;  %s517_s14 = scalar_lea.vmem %s637_s8, 32 }
  0x2f   : > { %p514_p11 = scmp.ne.s32.totalorder %s507_s3, %s513_s7  ;;  %p519_p7 = scmp.lt.s32.totalorder %s517_s14, %s513_s7 }
  0x31   : > { %p515_p0 = pnand %p514_p11, %p725_p13 }
  0x33   : > { %p516_p1 = pneg %p515_p0 }
  0x35   : > { %p521_p10 = pnand %p519_p7, %p516_p1 }
  0x37   : > { %524 = shalt.err (!%p521_p10)
}
  0x38   : > { %s865_s23 = sshll.u32 %s874_s26, 7 }
  0x39   : > { %140 = dma.hbm_to_vmem [thread:$0]  (%p725_p13), %s136_s16, %s865_s23, %s138_s17, %s722_s30  }
  0x3a PF: > { %143 = sbr.rel (!%p693_p5) target bundleno = 92 (0x5c), region = 24  ;;  %s144_s24 = sand.u32 (%p693_p5), 1, %s631_s11  }
  0x3b   : > { %s427_s25 = sshll.u32 (%p693_p5), %s635_s12, 1  ;;  %s426_s27 = sshll.u32 (%p693_p5), %s144_s24, 1 }
  0x3c   : > { %s150_s28 = ssub.s32 (%p693_p5), 3, %s427_s25  ;;  %s761_s29 = scalar_lea.sflag (%p693_p5), [#allocation6], %s144_s24 }
  0x3d   : > { %p151_p11 = scmp.lt.s32.totalorder (%p693_p5), %s150_s28, 2  ;;  %s148_s26 = scalar_lea.vmem (%p693_p5), [#allocation5], %s426_s27 }
  0x3f   : > { %s876_s28 = smov (!%p151_p11, %s150_s28), 2 }
  0x40   : > { %s153_s14 = ssub.s32 2, %s876_s28 }
  0x41   : > { %s154_s4 = sshll.u32 %s153_s14, 4 }
  0x42   : > { %155 = vsyncadd %s761_s29, %s154_s4  ;;  %p428_p5 = scmp.ne.s32.totalorder %s876_s28, 0  ;;  %s157_s16 = scalar_lea.hbm %s855_s1, %s427_s25 }
  0x43   : > { %s158_s17 = sshll.u32 %s876_s28, 4  ;;  %s159_s5 = sshll.u32 %s157_s16, 4  ;;  %s769_s5 = int_to_ptr.hbm [resolvable:$true] %s159_s5 }
  0x44   : > { %s771_s6 = sshll.u32 %s148_s26, 4  ;;  %s526_s3 = sshra.s32 %s769_s5, 4  ;;  %s162_s6 = int_to_ptr.vmem [resolvable:$true] %s771_s6  ;;  %s527_s3 = int_to_ptr.hbm [resolvable:$true] %s526_s3 }
  0x45   : > { %s528_s7 = sshrl.u32 %s158_s17, 4  ;;  %s537_s25 = scalar_lea.hbm %s855_s1, 3 }
  0x46   : > { %s533_s8 = scalar_lea.hbm %s527_s3, %s528_s7  ;;  %p538_p2 = scmp.lt.s32.totalorder %s527_s3, %s855_s1 }
  0x47   : > { %p534_p7 = scmp.ne.s32.totalorder %s527_s3, %s533_s8  ;;  %p539_p3 = scmp.lt.s32.totalorder %s537_s25, %s533_s8 }
  0x49   : > { %p535_p10 = pnand %p534_p7, %p428_p5  ;;  %p540_p4 = por %p539_p3, %p538_p2 }
  0x4b   : > { %p536_p13 = pneg %p535_p10 }
  0x4d   : > { %p541_p8 = pnand %p540_p4, %p536_p13 }
  0x4f   : > { %544 = shalt.err (!%p541_p8)
}
  0x50   : > { %s545_s4 = sshra.s32 %s162_s6, 4  ;;  %s638_s19 = smov [#allocation5]   ;;  %s546_s4 = int_to_ptr.vmem [resolvable:$true] %s545_s4 }
  0x51   : > { %s552_s26 = scalar_lea.vmem %s546_s4, %s528_s7  ;;  %s556_s30 = scalar_lea.vmem %s638_s19, 4 }
  0x52   : > { %p553_p12 = scmp.ne.s32.totalorder %s546_s4, %s552_s26  ;;  %p558_p11 = scmp.lt.s32.totalorder %s556_s30, %s552_s26 }
  0x54   : > { %p554_p0 = pnand %p553_p12, %p428_p5 }
  0x56   : > { %p555_p1 = pneg %p554_p0 }
  0x58   : > { %p560_p7 = pnand %p558_p11, %p555_p1 }
  0x5a   : > { %563 = shalt.err (!%p560_p7)
}
  0x5b   : > { %164 = dma.hbm_to_vmem [thread:$0]  (%p428_p5), %s769_s5, %s158_s17, %s162_s6, %s761_s29  }
  0x5c PF: > { %p429_p10 = scmp.ge.s32.totalorder %s635_s12, 1  ;;  %p166_p13 = scmp.lt.s32.totalorder %s635_s12, 3 }
  0x5e   : > { %p167_p2 = pnand %p429_p10, %p166_p13 }
  0x5f   : > { %s796_s16 = sand.u32 (!%p167_p2), 1, %s627_s10  }
  0x60   : > { %170 = sbr.rel (%p167_p2) target bundleno = 193 (0xc1), region = 28  ;;  %s430_s3 = sshll.u32 (!%p167_p2), %s796_s16, 4 }
  0x61   : > { %s173_s7 = scalar_lea.sflag (!%p167_p2), [#allocation3], %s796_s16  ;;  %s176_s8 = scalar_lea.vmem (!%p167_p2), [#allocation2], %s430_s3 }
  0x65   : > { %610 = dma.done.wait (%p697_p6), %s173_s7, 256  }
  0x66   : > { %612 = vsyncadd (%p697_p6), %s173_s7, 4294967040  ;;  %s431_s28 = sshll.u32 %s796_s16, 1  ;;  %s183_s29 = scalar_lea.sflag [#allocation6], %s796_s16 }
  0x67   : > { %s186_s17 = scalar_lea.vmem [#allocation5], %s431_s28 }
  0x68   : > { %614 = dma.done.wait (%p697_p6), %s183_s29, 32  }
  0x69   : > { %616 = vsyncadd (%p697_p6), %s183_s29, 4294967264  ;;  %v221_v0 = vld [vmem:[%s176_s8] sm:$0x1f]  ;;  %v222_v1 = vld [vmem:[%s176_s8 + $0x8] sm:$0x1f]  ;;  %vm225_vm0 = vcmask 1044480   ;;  %v267_v14 = vlaneseq }
  0x6a   : > { %v223_v2 = vmul.f32 0.9, %v221_v0  ;;  %v224_v3 = vmul.f32 0.9, %v222_v1  ;;  %v266_v15 = vld [vmem:[%s186_s17] sm:$0x3] }
  0x6b   : > { %v268_v20 = vshrl.u32 %v267_v14, 7  ;;  %v269_v21 = vperm.slane %v266_v15, 0  ;;  %v270_v22 = vperm.slane %v266_v15, 1  ;;  %s211_s20 = scalar_lea.vmem [#allocation7], %s796_s16  ;;  %p432_p6 = scmp.ne.s32.totalorder %s675_s13, 1 }
  0x6c   : > { %v226_v4 = vsel %vm225_vm0, %v223_v2, -inf  ;;  %v233_v5 = vsel %vm225_vm0, %v224_v3, -inf  ;;  %s433_s5 = sshll.u32 (!%p432_p6), %s675_s13, 8 }
  0x6d   : > { %v227_v6 = vrot.slane %v226_v4, 4  ;;  %v234_v7 = vrot.slane %v233_v5, 4  ;;  %vm271_vm1 = vcmp.eq.s32.totalorder %v268_v20, %v269_v21  ;;  %vm272_vm2 = vcmp.eq.s32.totalorder %v268_v20, %v270_v22 }
  0x6e   : > { %v273_v27 = vsel %vm271_vm1, %v223_v2, 0.0  ;;  %v274_v28 = vsel %vm272_vm2, %v224_v3, 0.0 }
  0x6f   : > { %v228_v8 = vmax.f32 %v226_v4, %v227_v6  ;;  %v235_v9 = vmax.f32 %v233_v5, %v234_v7  ;;  %v275_v29 = vsel %vm225_vm0, %v273_v27, 0.0  ;;  %v282_v30 = vsel %vm225_vm0, %v274_v28, 0.0 }
  0x70   : > { %v276_v34 = vrot.slane %v275_v29, 4  ;;  %v283_v37 = vrot.slane %v282_v30, 4 }
  0x71   : > { %v229_v10 = vrot.slane %v228_v8, 2  ;;  %v236_v11 = vrot.slane %v235_v9, 2 }
  0x72   : > { %v277_v41 = vadd.f32 %v276_v34, %v275_v29  ;;  %v284_v43 = vadd.f32 %v283_v37, %v282_v30 }
  0x73   : > { %v230_v12 = vmax.f32 %v228_v8, %v229_v10  ;;  %v237_v13 = vmax.f32 %v235_v9, %v236_v11 }
  0x74   : > { %v278_v47 = vrot.slane %v277_v41, 2  ;;  %v285_v49 = vrot.slane %v284_v43, 2 }
  0x75   : > { %v231_v16 = vrot.slane %v230_v12, 1  ;;  %v238_v17 = vrot.slane %v237_v13, 1 }
  0x76   : > { %v279_v53 = vadd.f32 %v278_v47, %v277_v41  ;;  %v286_v54 = vadd.f32 %v285_v49, %v284_v43 }
  0x77   : > { %v232_v18 = vmax.f32 %v230_v12, %v231_v16  ;;  %v239_v19 = vmax.f32 %v237_v13, %v238_v17 }
  0x78   : > { %v280_v55 = vrot.slane %v279_v53, 1  ;;  %v287_v56 = vrot.slane %v286_v54, 1 }
  0x79   : > { %v240_v23 = vsub.f32 %v223_v2, %v232_v18  ;;  %v241_v24 = vsub.f32 %v224_v3, %v239_v19 }
  0x7a   : > { %v281_v60 = vadd.f32 %v280_v55, %v279_v53  ;;  %v288_v62 = vadd.f32 %v287_v56, %v286_v54 }
  0x7b   : > { %v242_v25 = vmul.f32 1.442695, %v240_v23  ;;  %v244_v26 = vmul.f32 1.442695, %v241_v24 }
  0x7d   : > { %479 = vpow2.f32 %v242_v25 }
  0x7e   : > { %481 = vpow2.f32 %v244_v26 }
  0x83   : > { %v480_v31 = vpop.eup %479 }
  0x84   : > { %v482_v32 = vpop.eup %481  ;;  %v246_v33 = vsel %vm225_vm0, %v480_v31, 0.0 }
  0x85   : > { %v247_v35 = vrot.slane %v246_v33, 4  ;;  %v253_v36 = vsel %vm225_vm0, %v482_v32, 0.0 }
  0x86   : > { %v254_v38 = vrot.slane %v253_v36, 4 }
  0x87   : > { %v248_v39 = vadd.f32 %v247_v35, %v246_v33 }
  0x88   : > { %v255_v40 = vadd.f32 %v254_v38, %v253_v36 }
  0x89   : > { %v249_v42 = vrot.slane %v248_v39, 2 }
  0x8a   : > { %v256_v44 = vrot.slane %v255_v40, 2 }
  0x8b   : > { %v250_v45 = vadd.f32 %v249_v42, %v248_v39 }
  0x8c   : > { %v257_v46 = vadd.f32 %v256_v44, %v255_v40 }
  0x8d   : > { %v251_v48 = vrot.slane %v250_v45, 1 }
  0x8e   : > { %v258_v50 = vrot.slane %v257_v46, 1 }
  0x8f   : > { %v252_v51 = vadd.f32 %v251_v48, %v250_v45 }
  0x90   : > { %v259_v52 = vadd.f32 %v258_v50, %v257_v46 }
  0x91   : > { %483 = vlog2.f32 %v252_v51 }
  0x92   : > { %485 = vlog2.f32 %v259_v52 }
  0x97   : > { %v484_v57 = vpop.eup %483 }
  0x98   : > { %v486_v58 = vpop.eup %485  ;;  %v261_v59 = vmul.f32 0.6931472, %v484_v57 }
  0x99   : > { %v263_v61 = vmul.f32 0.6931472, %v486_v58  ;;  %294 = sbr.rel (%p432_p6) target bundleno = 169 (0xa9), region = 40 }
  0x9a   : > { %v264_v63 = vadd.f32 %v261_v59, %v232_v18 }
  0x9b   : > { %v265_v0 = vadd.f32 %v263_v61, %v239_v19 }
  0x9c   : > { %v289_v1 = vsub.f32 %v264_v63, %v281_v60 }
  0x9d   : > { %v290_v2 = vsub.f32 %v265_v0, %v288_v62 }
  0x9e   : > { %v297_v3 = vand.u32 127, %v267_v14  ;;  %v299_v4 = vstv %s433_s5 }
  0xa0   : > { %v298_v5 = vadd.s32 128, %v297_v3  ;;  %v300_v6 = vadd.s32 %v299_v4, %v297_v3 }
  0xa2   : > { %v301_v7 = vadd.s32 %v299_v4, %v298_v5  ;;  %vm302_vm3 = vcmp.lt.s32.totalorder %v300_v6, 300 }
  0xa3   : > { %v304_v8 = vsel %vm302_vm3, %v289_v1, 0.0 }
  0xa4   : > { %vm303_vm4 = vcmp.lt.s32.totalorder %v301_v7, 300 }
  0xa5   : > { %v305_v9 = vsel %vm303_vm4, %v290_v2, 0.0 }
  0xa6   : > { %v306_v10 = vadd.f32 %v305_v9, %v304_v8 }
  0xa8   : > { %307 = vst [vmem:[%s211_s20] sm:$0x1] %v306_v10 }
  0xa9 PF: > { %p866_p5 = scmp.eq.s32.totalorder %s675_s13, 1 }
  0xab   : > { %311 = sbr.rel (%p866_p5) target bundleno = 179 (0xb3), region = 44 }
  0xb0   : > { %v312_v11 = vadd.f32 %v290_v2, %v289_v1 }
  0xb2   : > { %313 = vst [vmem:[%s211_s20] sm:$0x1] %v312_v11 }
  0xb3 PF: > { %s323_s24 = scalar_lea.hbm %s856_s2, %s675_s13  ;;  %s325_s25 = sshll.u32 %s211_s20, 4  ;;  %s326_s25 = int_to_ptr.vmem [resolvable:$true] %s325_s25 }
  0xb4   : > { %s327_s27 = sshll.u32 %s323_s24, 4  ;;  %s315_s14 = scalar_lea.sflag [#allocation4], %s796_s16  ;;  %s328_s27 = int_to_ptr.hbm [resolvable:$true] %s327_s27 }
  0xb5   : > { %s579_s4 = sshra.s32 %s328_s27, 4  ;;  %s585_s3 = scalar_lea.hbm %s856_s2, 2  ;;  %s580_s4 = int_to_ptr.hbm [resolvable:$true] %s579_s4 }
  0xb6   : > { %s581_s26 = scalar_lea.hbm %s580_s4, 1  ;;  %p586_p12 = scmp.lt.s32.totalorder %s580_s4, %s856_s2 }
  0xb7   : > { %p582_p3 = scmp.ne.s32.totalorder %s580_s4, %s581_s26  ;;  %p587_p0 = scmp.lt.s32.totalorder %s585_s3, %s581_s26 }
  0xb9   : > { %p583_p4 = pnand %p582_p3, %p704_p9  ;;  %p588_p1 = por %p587_p0, %p586_p12 }
  0xbb   : > { %p584_p8 = pneg %p583_p4 }
  0xbd   : > { %p589_p11 = pnand %p588_p1, %p584_p8 }
  0xbf   : > { %592 = shalt.err (!%p589_p11)
}
  0xc0   : > { %440 = dma.vmem_to_hbm [thread:$0]  (%p704_p9), %s326_s25, 16, %s328_s27, %s315_s14  }
  0xc1 PF: > { %s339_s13 = sand.u32 1, %s623_s9   ;;  %p867_p7 = scmp.ne.s32.totalorder %s863_s22, 0 }
  0xc2   : > { %p868_p10 = scmp.ge.s32.totalorder %s635_s12, 2  ;;  %s340_s16 = scalar_lea.sflag [#allocation4], %s339_s13 }
  0xc4   : > { %p443_p13 = pnand %p868_p10, %p867_p7 }
  0xc6   : > { %p444_p2 = pneg %p443_p13 }
  0xc8   : > { %618 = dma.done.wait (%p444_p2), %s340_s16, 16  }
  0xc9   : > { %620 = vsyncadd (%p444_p2), %s340_s16, 4294967280  ;;  %p18_p6 = scmp.ge.s32.totalorder %s679_s15, 4   ;;  %s869_s9 = smov %s627_s10 }
  0xca   : > { %s870_s10 = smov %s631_s11  ;;  %s871_s11 = smov %s691_s18 }
  0xcb   : > { %s872_s12 = smov %s679_s15  ;;  %20 = sbr.rel (!%p18_p6) target bundleno = 7 (0x7), region = 94 }
  0xd0   :  { %345 = vsyncpa [#allocation3], 1 }
  0xd1   :  { %347 = vsyncpa [#allocation3 + $0x1], 1 }
  0xd2   :  { %348 = vsyncpa [#allocation6], 1 }
  0xd3   :  { %350 = vsyncpa [#allocation6 + $0x1], 1 }
  0xd4   :  { %351 = vsyncpa [#allocation4], 1 }
  0xd5   :  { %353 = vsyncpa [#allocation4 + $0x1], 1 }

</bundles_post_ra>
